<compile_context>
chip_gen: v5e
topology: v5e:2x2
jax: 0.10.0
libtpu: 0.0.40
codegen_flags: <defaults>
</compile_context>

<pallas_src>
import functools
import math

import jax
import jax.numpy as jnp
from jax import lax
from jax.experimental import pallas as pl
from jax.experimental.pallas import tpu as pltpu

EPS = 1e-8
LOG_EPS = math.log(EPS)   # ~ -18.42


# ---------------------------------------------------------------------------
# Kernels
# ---------------------------------------------------------------------------
def _phi_kernel(x_ref, w_ref, b_ref, out_ref, *, tau):
    z = w_ref[...] * x_ref[...] + b_ref[...]                      # (TB, F)
    # sigmoid(z, tau) == 0.5 * (tanh(0.5*tau*z) + 1): single EUP op, no divide.
    out_ref[...] = (0.5 * (jnp.tanh((0.5 * tau) * z) + 1.0)).astype(out_ref.dtype)


def _phi_entropy_kernel(x_ref, w_ref, b_ref, out_ref, ent_ref, *,
                        tau, block_rows, batch, padded_batch):
    t = tau * (w_ref[...] * x_ref[...] + b_ref[...])              # logits, f32
    # Shared-exponential sigmoid + log-sigmoids (2 transcendentals, no overflow):
    #   e          = exp(-|t|)  in (0, 1]
    #   sp         = log(1+e)   = softplus(-|t|)
    #   log(out)   = -softplus(-t) = -(relu(-t) + sp)
    #   log(1-out) = -softplus( t) =  log(out) - t
    #   out        = 1/(1+e)       if t >= 0  else  1 - 1/(1+e)
    e = jnp.exp(-jnp.abs(t))
    sp = jnp.log(1.0 + e)
    inv = 1.0 / (1.0 + e)
    out = jnp.where(t >= 0.0, inv, 1.0 - inv)
    log_out = -(jnp.maximum(-t, 0.0) + sp)
    log_1m_out = log_out - t
    # eps clamp: log(p + 1e-8) >= log(1e-8); only differs where the p-factor -> 0,
    # so the mean matches the reference to ~1e-8.
    term = (out * jnp.maximum(log_out, LOG_EPS)
            - (1.0 - out) * jnp.maximum(log_1m_out, LOG_EPS))

    if padded_batch != batch:  # static condition: mask padded rows out of partials
        row = (pl.program_id(0) * block_rows
               + lax.broadcasted_iota(jnp.int32, term.shape, 0))
        term = jnp.where(row < batch, term, 0.0)

    out_ref[...] = out.astype(out_ref.dtype)
    # Per-tile lane-dense (8, F) partial sums (sublane reduce only); the wrapper
    # finishes the global sum / mean / negation.
    ent_ref[...] = jnp.sum(term.reshape(-1, 8, term.shape[-1]), axis=0)


# ---------------------------------------------------------------------------
# Wrapper helpers
# ---------------------------------------------------------------------------
def _round_up(n, m):
    return ((n + m - 1) // m) * m


def _sublane_multiple(*dtypes):
    # f32 -> 8 rows, bf16/f16 -> 16, int8/fp8 -> 32 per (sublane x lane) tile.
    return max(8, *(32 // jnp.dtype(d).itemsize for d in dtypes))


def _choose_block_rows(batch, features, x_dtype, out_dtype, target_bytes):
    mult = _sublane_multiple(x_dtype, out_dtype)
    b_up = _round_up(batch, mult)
    per_row = max(1, features * jnp.dtype(x_dtype).itemsize)
    rows = max(mult, (target_bytes // per_row) // mult * mult)
    rows = min(rows, b_up)
    # Prefer an even tile count so the ("parallel",) grid splits cleanly across
    # the two TensorCores of a v7x megacore.
    n_tiles = -(-b_up // rows)
    if n_tiles > 1 and n_tiles % 2 == 1 and rows >= 2 * mult:
        rows = _round_up(rows // 2, mult)
    return rows


def _vmem_limit_bytes(needed):
    try:
        cap = int(getattr(pltpu.get_tpu_info(), "vmem_capacity_bytes", 64 << 20))
    except Exception:
        cap = 64 << 20  # conservative: v7x has 64 MiB per TensorCore
    return int(min(max(needed, 4 << 20), (cap * 3) // 4))


# ---------------------------------------------------------------------------
# Forward pass
# ---------------------------------------------------------------------------
def phi_forward(x, w_, b, *, calculate_entropy=False, tau=10.0, out_dtype=None,
                block_rows=None, target_bytes=4 << 20, min_pallas_bytes=256 << 10):
    """Phi forward.  x: (B, F); w_, b: (F,).  Returns out (and entropy)."""
    B, F = x.shape
    out_dtype = jnp.dtype(x.dtype) if out_dtype is None else jnp.dtype(out_dtype)
    tau = float(tau)

    # Hoist w = exp(w_) out of the per-tile hot path (identical math).
    w2 = jnp.exp(w_).astype(jnp.float32).reshape(1, F)
    b2 = b.astype(jnp.float32).reshape(1, F)

    # Small-input fast path: pallas_call / pipeline setup dominates tiny shapes.
    if x.size * jnp.dtype(x.dtype).itemsize < min_pallas_bytes:
        out = (1.0 / (1.0 + jnp.exp(-tau * (w2 * x + b2)))).astype(out_dtype)
        if calculate_entropy:
            o = out.astype(jnp.float32)
            ent = -jnp.mean(o * jnp.log(o + EPS) - (1.0 - o) * jnp.log(1.0 - o + EPS))
            return out, ent
        return out

    # Tile choice + batch padding (ragged batches stream instead of one giant tile).
    if block_rows is None:
        block_rows = _choose_block_rows(B, F, x.dtype, out_dtype, target_bytes)
    else:
        block_rows = _round_up(int(block_rows), _sublane_multiple(x.dtype, out_dtype))
    Bp = _round_up(B, block_rows)
    if Bp != B:
        x = jnp.pad(x, ((0, Bp - B), (0, 0)))
    num_tiles = Bp // block_rows

    # TODO(synk): if F % 128 != 0 and the consumer can accept a padded feature
    # dim, pad x/w/b to a lane multiple (w=b=0 pad contributes 0 entropy) to get
    # unmasked lane-dense stores.

    itemsize = jnp.dtype(x.dtype).itemsize
    needed = (2 * block_rows * F * (itemsize + out_dtype.itemsize)
              + 16 * F * 4 + (1 << 20))
    cparams = pltpu.CompilerParams(
        dimension_semantics=("parallel",),       # no cross-step state
        vmem_limit_bytes=_vmem_limit_bytes(needed),
    )

    x_spec = pl.BlockSpec((block_rows, F), lambda i: (i, 0))
    p_spec = pl.BlockSpec((1, F), lambda i: (0, 0))
    o_spec = pl.BlockSpec((block_rows, F), lambda i: (i, 0))

    if calculate_entropy:
        out, ent_part = pl.pallas_call(
            functools.partial(_phi_entropy_kernel, tau=tau, block_rows=block_rows,
                              batch=B, padded_batch=Bp),
            out_shape=(
                jax.ShapeDtypeStruct((Bp, F), out_dtype),
                jax.ShapeDtypeStruct((num_tiles * 8, F), jnp.float32),
            ),
            grid_spec=pltpu.PrefetchScalarGridSpec(
                num_scalar_prefetch=0,
                grid=(num_tiles,),
                in_specs=[x_spec, p_spec, p_spec],
                out_specs=(
                    o_spec,
                    pl.BlockSpec((8, F), lambda i: (i, 0)),
                ),
            ),
            compiler_params=cparams,
        )(x, w2, b2)
        entropy = -(jnp.sum(ent_part, dtype=jnp.float32) / jnp.float32(B * F))
        out = out[:B] if Bp != B else out
        return out, entropy

    out = pl.pallas_call(
        functools.partial(_phi_kernel, tau=tau),
        out_shape=jax.ShapeDtypeStruct((Bp, F), out_dtype),
        grid_spec=pltpu.PrefetchScalarGridSpec(
            num_scalar_prefetch=0,
            grid=(num_tiles,),
            in_specs=[x_spec, p_spec, p_spec],
            out_specs=o_spec,
        ),
        compiler_params=cparams,
    )(x, w2, b2)
    return out[:B] if Bp != B else out


# ---------------------------------------------------------------------------
# Self-test
# ---------------------------------------------------------------------------
if __name__ == "__main__":
    key = jax.random.PRNGKey(0)
    k_x, k_w, k_b, k_x2 = jax.random.split(key, 4)

    B, F = 16, 128  # small shapes: batch=16, features=128
    x = jax.random.normal(k_x, (B, F), dtype=jnp.float32)

    # Deterministic init matching Phi.reset_parameters():
    #   w_ = log(uniform(0.1, 0.9) + 1e-8), b = uniform(-0.9, -0.1)
    w_raw = jax.random.uniform(k_w, (F,), minval=0.1, maxval=0.9, dtype=jnp.float32)
    w_ = jnp.log(w_raw + 1e-8)
    b = jax.random.uniform(k_b, (F,), minval=-0.9, maxval=-0.1, dtype=jnp.float32)

    def ref_forward(xv):
        w = jnp.exp(w_)
        o = 1.0 / (1.0 + jnp.exp(-10.0 * (w * xv + b)))
        ent = -jnp.mean(o * jnp.log(o + EPS) - (1.0 - o) * jnp.log(1.0 - o + EPS))
        return o, ent

    # Pallas path (forced; the default small-input fast path would bypass it).
    out_e, entropy = phi_forward(x, w_, b, calculate_entropy=True, min_pallas_bytes=0)
    out_ne = phi_forward(x, w_, b, calculate_entropy=False, min_pallas_bytes=0)
    jax.block_until_ready((out_e, entropy, out_ne))

    ref, ref_ent = ref_forward(x)
    assert jnp.allclose(out_e, ref, atol=1e-5), "output (entropy path) mismatch"
    assert jnp.allclose(out_ne, ref, atol=1e-5), "output mismatch"
    assert jnp.allclose(entropy, ref_ent, atol=1e-5), "entropy mismatch"

    # Ragged batch: exercises batch padding + in-kernel entropy masking.
    B2 = 12
    x2 = jax.random.normal(k_x2, (B2, F), dtype=jnp.float32)
    out2, ent2 = phi_forward(x2, w_, b, calculate_entropy=True, min_pallas_bytes=0)
    jax.block_until_ready((out2, ent2))
    ref2, ref2_ent = ref_forward(x2)
    assert out2.shape == (B2, F)
    assert jnp.allclose(out2, ref2, atol=1e-5), "ragged output mismatch"
    assert jnp.allclose(ent2, ref2_ent, atol=1e-5), "ragged entropy mismatch"

    # Default small-input fast path (plain XLA for tiny shapes).
    out_s, ent_s = phi_forward(x, w_, b, calculate_entropy=True)
    jax.block_until_ready((out_s, ent_s))
    assert jnp.allclose(out_s, ref, atol=1e-5), "fast-path output mismatch"
    assert jnp.allclose(ent_s, ref_ent, atol=1e-5), "fast-path entropy mismatch"

    print("KERNEL_OK")
</pallas_src>

<mosaic_0001>
module attributes {stable_mosaic.version = 11 : i64} {
  func.func @_phi_entropy_kernel(%arg0: i32, %arg1: memref<16x128xf32, #tpu.memory_space<vmem>>, %arg2: memref<1x128xf32, #tpu.memory_space<vmem>>, %arg3: memref<1x128xf32, #tpu.memory_space<vmem>>, %arg4: memref<16x128xf32, #tpu.memory_space<vmem>>, %arg5: memref<8x128xf32, #tpu.memory_space<vmem>>) attributes {dimension_semantics = [#tpu.dimension_semantics<parallel>], iteration_bounds = array<i64: 1>, scalar_prefetch = 0 : i64, scratch_operands = 0 : i64, tpu.core_type = #tpu.core_type<tc>, window_params = [{transform_indices = @transform_0, window_bounds = array<i64: 16, 128>}, {pipeline_mode = #tpu.pipeline_mode<synchronous>, transform_indices = @transform_1, window_bounds = array<i64: 1, 128>}, {pipeline_mode = #tpu.pipeline_mode<synchronous>, transform_indices = @transform_2, window_bounds = array<i64: 1, 128>}, {transform_indices = @transform_3, window_bounds = array<i64: 16, 128>}, {transform_indices = @transform_4, window_bounds = array<i64: 8, 128>}]} {
    %c0 = arith.constant 0 : index
    %c0_0 = arith.constant 0 : index
    %0 = vector.load %arg2[%c0, %c0_0] : memref<1x128xf32, #tpu.memory_space<vmem>>, vector<1x128xf32>
    %c0_1 = arith.constant 0 : index
    %c0_2 = arith.constant 0 : index
    %1 = vector.load %arg1[%c0_1, %c0_2] : memref<16x128xf32, #tpu.memory_space<vmem>>, vector<16x128xf32>
    %2 = vector.broadcast %0 : vector<1x128xf32> to vector<16x128xf32>
    %3 = arith.mulf %2, %1 : vector<16x128xf32>
    %c0_3 = arith.constant 0 : index
    %c0_4 = arith.constant 0 : index
    %4 = vector.load %arg3[%c0_3, %c0_4] : memref<1x128xf32, #tpu.memory_space<vmem>>, vector<1x128xf32>
    %5 = vector.broadcast %4 : vector<1x128xf32> to vector<16x128xf32>
    %6 = arith.addf %3, %5 : vector<16x128xf32>
    %cst = arith.constant 1.000000e+01 : f32
    %7 = vector.broadcast %cst : f32 to vector<16x128xf32>
    %8 = arith.mulf %7, %6 : vector<16x128xf32>
    %9 = math.absf %8 : vector<16x128xf32>
    %cst_5 = arith.constant 0.000000e+00 : f32
    %10 = vector.broadcast %cst_5 : f32 to vector<16x128xf32>
    %11 = arith.subf %10, %9 : vector<16x128xf32>
    %12 = math.exp %11 : vector<16x128xf32>
    %cst_6 = arith.constant 1.000000e+00 : f32
    %13 = vector.broadcast %cst_6 : f32 to vector<16x128xf32>
    %14 = arith.addf %13, %12 : vector<16x128xf32>
    %15 = math.log %14 : vector<16x128xf32>
    %cst_7 = arith.constant 1.000000e+00 : f32
    %16 = vector.broadcast %cst_7 : f32 to vector<16x128xf32>
    %17 = arith.addf %16, %12 : vector<16x128xf32>
    %cst_8 = arith.constant 1.000000e+00 : f32
    %18 = vector.broadcast %cst_8 : f32 to vector<16x128xf32>
    %19 = arith.divf %18, %17 : vector<16x128xf32>
    %cst_9 = arith.constant 0.000000e+00 : f32
    %20 = vector.broadcast %cst_9 : f32 to vector<16x128xf32>
    %21 = arith.cmpf oge, %8, %20 : vector<16x128xf32>
    %cst_10 = arith.constant 1.000000e+00 : f32
    %22 = vector.broadcast %cst_10 : f32 to vector<16x128xf32>
    %23 = arith.subf %22, %19 : vector<16x128xf32>
    %24 = arith.select %21, %19, %23 : vector<16x128xi1>, vector<16x128xf32>
    %cst_11 = arith.constant 0.000000e+00 : f32
    %25 = vector.broadcast %cst_11 : f32 to vector<16x128xf32>
    %26 = arith.subf %25, %8 : vector<16x128xf32>
    %cst_12 = arith.constant 0.000000e+00 : f32
    %27 = vector.broadcast %cst_12 : f32 to vector<16x128xf32>
    %28 = arith.maximumf %26, %27 : vector<16x128xf32>
    %29 = arith.addf %28, %15 : vector<16x128xf32>
    %cst_13 = arith.constant 0.000000e+00 : f32
    %30 = vector.broadcast %cst_13 : f32 to vector<16x128xf32>
    %31 = arith.subf %30, %29 : vector<16x128xf32>
    %32 = arith.subf %31, %8 : vector<16x128xf32>
    %cst_14 = arith.constant -18.420681 : f32
    %33 = vector.broadcast %cst_14 : f32 to vector<16x128xf32>
    %34 = arith.maximumf %31, %33 : vector<16x128xf32>
    %35 = arith.mulf %24, %34 : vector<16x128xf32>
    %cst_15 = arith.constant 1.000000e+00 : f32
    %36 = vector.broadcast %cst_15 : f32 to vector<16x128xf32>
    %37 = arith.subf %36, %24 : vector<16x128xf32>
    %cst_16 = arith.constant -18.420681 : f32
    %38 = vector.broadcast %cst_16 : f32 to vector<16x128xf32>
    %39 = arith.maximumf %32, %38 : vector<16x128xf32>
    %40 = arith.mulf %37, %39 : vector<16x128xf32>
    %41 = arith.subf %35, %40 : vector<16x128xf32>
    %c0_17 = arith.constant 0 : index
    %c0_18 = arith.constant 0 : index
    %42 = vector.load %arg4[%c0_17, %c0_18] : memref<16x128xf32, #tpu.memory_space<vmem>>, vector<16x128xf32>
    tpu.vector_store %arg4[%c0_17, %c0_18], %24 {strides = array<i32>} : memref<16x128xf32, #tpu.memory_space<vmem>>, vector<16x128xf32>,
    %43 = vector.shape_cast %41 : vector<16x128xf32> to vector<2x8x128xf32>
    %cst_19 = arith.constant dense<0.000000e+00> : vector<8x128xf32>
    %44 = vector.multi_reduction <add>, %43, %cst_19 [0] : vector<2x8x128xf32> to vector<8x128xf32>
    %c0_20 = arith.constant 0 : index
    %c0_21 = arith.constant 0 : index
    %45 = vector.load %arg5[%c0_20, %c0_21] : memref<8x128xf32, #tpu.memory_space<vmem>>, vector<8x128xf32>
    tpu.vector_store %arg5[%c0_20, %c0_21], %44 {strides = array<i32>} : memref<8x128xf32, #tpu.memory_space<vmem>>, vector<8x128xf32>,
    return
  }
  func.func @transform_0(%arg0: i32) -> (i32, i32) {
    %c0_i32 = arith.constant 0 : i32
    %c0_i32_0 = arith.constant 0 : i32
    return %arg0, %c0_i32 : i32, i32
  }
  func.func @transform_1(%arg0: i32) -> (i32, i32) {
    %c0_i32 = arith.constant 0 : i32
    %c0_i32_0 = arith.constant 0 : i32
    %c0_i32_1 = arith.constant 0 : i32
    return %c0_i32, %c0_i32_0 : i32, i32
  }
  func.func @transform_2(%arg0: i32) -> (i32, i32) {
    %c0_i32 = arith.constant 0 : i32
    %c0_i32_0 = arith.constant 0 : i32
    %c0_i32_1 = arith.constant 0 : i32
    return %c0_i32, %c0_i32_0 : i32, i32
  }
  func.func @transform_3(%arg0: i32) -> (i32, i32) {
    %c0_i32 = arith.constant 0 : i32
    %c0_i32_0 = arith.constant 0 : i32
    return %arg0, %c0_i32 : i32, i32
  }
  func.func @transform_4(%arg0: i32) -> (i32, i32) {
    %c0_i32 = arith.constant 0 : i32
    %c0_i32_0 = arith.constant 0 : i32
    return %arg0, %c0_i32 : i32, i32
  }
}

</mosaic_0001>

<bundles_post_ra>
// kernel: tpu_custom_call.1
= control target key start
LH: loop header
LB: loop body
LE: loop exit
PB: predicated region body
PF: predicated region fallthrough
CT: control target
= control target key end

     0   :  { %10 = vsyncpa [#allocation3], 0  ;;  %s371_s0 = inlined_call_operand.hbm [shape: f32[16,128], index: 0, kind: input, shape index: {}]   ;;  %s372_s1 = inlined_call_operand.hbm [shape: f32[1,128], index: 1, kind: input, shape index: {}]   ;;  %s373_s2 = inlined_call_operand.vmem [shape: f32[1,128], index: 2, kind: input, shape index: {}]   ;;  %s374_s3 = inlined_call_operand.hbm [shape: f32[16,128], index: 3, kind: output, shape index: {0}]   ;;  %s375_s4 = inlined_call_operand.hbm [shape: f32[8,128], index: 4, kind: output, shape index: {1}]  }
   0x1   :  { %11 = vsyncpa [#allocation6], 0 }
   0x2   :  { %12 = vsyncpa [#allocation4], 0 }
   0x3   :  { %13 = vsyncpa [#allocation9], 0  ;;  %s18_s17 = sshll.u32 %s371_s0, 4  ;;  %s300_s18 = smov [#allocation2]   ;;  %s19_s17 = int_to_ptr.hbm [resolvable:$true] %s18_s17 }
   0x4   :  { %s20_s19 = sshll.u32 %s300_s18, 4  ;;  %s32_s22 = sshll.u32 %s372_s1, 4  ;;  %s21_s19 = int_to_ptr.vmem [resolvable:$true] %s20_s19  ;;  %s33_s22 = int_to_ptr.hbm [resolvable:$true] %s32_s22 }
   0x5   :  { %s301_s23 = smov 128   ;;  %s302_s24 = smov 8  }
   0x6   :  { %26 = dma.hbm_to_vmem [thread:$0]  %s19_s17, 256, %s21_s19, [#allocation3], %s301_s23, %s301_s23, %s302_s24  }
   0x7   :  { %s303_s25 = smov [#allocation5]  }
   0x8   :  { %s34_s26 = sshll.u32 %s303_s25, 4  ;;  %s35_s26 = int_to_ptr.vmem [resolvable:$true] %s34_s26 }
   0x9   :  { %37 = dma.hbm_to_vmem [thread:$0]  %s33_s22, 16, %s35_s26, [#allocation6]  }
   0xa   :  { %292 = dma.done.wait [#allocation3], 256  }
   0xb   :  { %293 = vsyncadd [#allocation3], 4294967040 }
   0xc   :  { %294 = dma.done.wait [#allocation6], 16  }
   0xd   :  { %295 = vsyncadd [#allocation6], 4294967280  ;;  %v49_v0 = vld [vmem:[#allocation2] sm:$0xff]  ;;  %v182_v1 = vld [vmem:[#allocation5] ss:$0 sm:$0xff]  ;;  %s304_s1 = smov [#allocation7]  }
   0xe   :  { %v183_v2 = vld [vmem:[%s373_s2] ss:$0 sm:$0xff]  ;;  %v50_v3 = vld [vmem:[#allocation2 + $0x8] sm:$0xff]  ;;  %v54_v4 = vmul.f32 %v182_v1, %v49_v0  ;;  %s144_s2 = sshll.u32 %s304_s1, 4  ;;  %s146_s30 = sshll.u32 %s374_s3, 4  ;;  %s145_s2 = int_to_ptr.vmem [resolvable:$true] %s144_s2  ;;  %s147_s30 = int_to_ptr.hbm [resolvable:$true] %s146_s30 }
   0xf   :  { %v55_v5 = vmul.f32 %v182_v1, %v50_v3  ;;  %s305_s3 = smov [#allocation8]   ;;  %s160_s8 = sshll.u32 %s375_s4, 4  ;;  %s161_s8 = int_to_ptr.hbm [resolvable:$true] %s160_s8 }
  0x10   :  { %v60_v6 = vadd.f32 %v183_v2, %v54_v4  ;;  %s158_s5 = sshll.u32 %s305_s3, 4  ;;  %s159_s5 = int_to_ptr.vmem [resolvable:$true] %s158_s5 }
  0x11   :  { %v61_v7 = vadd.f32 %v183_v2, %v55_v5 }
  0x12   :  { %v343_v8 = vmul.f32 10.0, %v60_v6 }
  0x13   :  { %v345_v9 = vmul.f32 10.0, %v61_v7 }
  0x14   :  { %v64_v10 = vand.u32 2147483647, %v343_v8  ;;  %v114_v20 = vsub.f32 0.0, %v343_v8  ;;  %vm108_vm8 = vcmp.ge.f32.partialorder %v343_v8, 0.0 }
  0x15   :  { %v65_v11 = vand.u32 2147483647, %v345_v9  ;;  %v115_v21 = vsub.f32 0.0, %v345_v9  ;;  %vm109_vm9 = vcmp.ge.f32.partialorder %v345_v9, 0.0 }
  0x16   :  { %v66_v12 = vsub.f32 0.0, %v64_v10  ;;  %v116_v22 = vmax.f32 %v114_v20, 0.0 }
  0x17   :  { %v67_v13 = vsub.f32 0.0, %v65_v11  ;;  %v117_v26 = vmax.f32 %v115_v21, 0.0 }
  0x18   :  { %v68_v14 = vmul.f32 1.442695, %v66_v12 }
  0x19   :  { %v70_v15 = vmul.f32 1.442695, %v67_v13 }
  0x1a   :  { %184 = vpow2.f32 %v68_v14 }
  0x1b   :  { %186 = vpow2.f32 %v70_v15 }
  0x20   :  { %v185_v16 = vpop.eup %184 }
  0x21   :  { %v187_v17 = vpop.eup %186  ;;  %v72_v18 = vadd.f32 1.0, %v185_v16 }
  0x22   :  { %v73_v19 = vadd.f32 1.0, %v187_v17 }
  0x23   :  { %188 = vlog2.f32 %v72_v18  ;;  %vm83_vm0 = vweird.f32 %v72_v18  ;;  %v89_v30 = vand.u32 2147483648, %v72_v18  ;;  %v87_v34 = vand.u32 2147483647, %v72_v18 }
  0x24   :  { %190 = vrcp.f32 %v72_v18  ;;  %vm98_vm2 = vweird.f32 %v73_v19  ;;  %v104_v37 = vand.u32 2147483648, %v73_v19  ;;  %v102_v41 = vand.u32 2147483647, %v73_v19 }
  0x25   :  { %192 = vlog2.f32 %v73_v19  ;;  %v90_v42 = vor.u32 1.1754944e-38, %v89_v30  ;;  %vm88_vm5 = vcmp.eq.f32.partialorder %v87_v34, 8.507059e+37 }
  0x26   :  { %194 = vrcp.f32 %v73_v19  ;;  %v105_v47 = vor.u32 1.1754944e-38, %v104_v37  ;;  %vm103_vm7 = vcmp.eq.f32.partialorder %v102_v41, 8.507059e+37 }
  0x29   :  { %v189_v23 = vpop.eup %188 }
  0x2a   :  { %v191_v24 = vpop.eup %190  ;;  %v75_v25 = vmul.f32 0.6931472, %v189_v23 }
  0x2b   :  { %v193_v27 = vpop.eup %192  ;;  %v79_v28 = vmul.f32 %v191_v24, %v72_v18  ;;  %vm84_vm1 = vweird.f32 %v191_v24 }
  0x2c   :  { %v195_v29 = vpop.eup %194  ;;  %v118_v31 = vadd.f32 %v116_v22, %v75_v25  ;;  %v77_v32 = vmul.f32 0.6931472, %v193_v27  ;;  %vm85_vm4 = vmor %vm83_vm0, %vm84_vm1 }
  0x2d   :  { %v80_v33 = vsub.f32 1.0, %v79_v28  ;;  %v94_v35 = vmul.f32 %v195_v29, %v73_v19  ;;  %vm99_vm3 = vweird.f32 %v195_v29 }
  0x2e   :  { %v120_v36 = vsub.f32 0.0, %v118_v31  ;;  %v119_v38 = vadd.f32 %v117_v26, %v77_v32  ;;  %vm352_vm6 = vmor %vm98_vm2, %vm99_vm3 }
  0x2f   :  { %v81_v39 = vmul.f32 %v191_v24, %v80_v33  ;;  %v95_v40 = vsub.f32 1.0, %v94_v35 }
  0x30   :  { %v121_v43 = vsub.f32 0.0, %v119_v38  ;;  %v122_v48 = vsub.f32 %v120_v36, %v343_v8  ;;  %v124_v52 = vmax.f32 %v120_v36, -18.420681 }
  0x31   :  { %v82_v44 = vadd.f32 %v191_v24, %v81_v39  ;;  %v96_v45 = vmul.f32 %v195_v29, %v95_v40 }
  0x32   :  { %v123_v53 = vsub.f32 %v121_v43, %v345_v9  ;;  %v125_v57 = vmax.f32 %v121_v43, -18.420681  ;;  %v130_v58 = vmax.f32 %v122_v48, -18.420681 }
  0x33   :  { %v86_v49 = vsel %vm85_vm4, %v191_v24, %v82_v44  ;;  %v97_v50 = vadd.f32 %v195_v29, %v96_v45 }
  0x34   :  { %v91_v51 = vsel %vm88_vm5, %v90_v42, %v86_v49  ;;  %v131_v63 = vmax.f32 %v123_v53, -18.420681 }
  0x35   :  { %v110_v54 = vsub.f32 1.0, %v91_v51  ;;  %v101_v55 = vsel %vm352_vm6, %v195_v29, %v97_v50 }
  0x36   :  { %v106_v56 = vsel %vm103_vm7, %v105_v47, %v101_v55 }
  0x37   :  { %v112_v59 = vsel %vm108_vm8, %v91_v51, %v110_v54  ;;  %v111_v60 = vsub.f32 1.0, %v106_v56 }
  0x38   :  { %v126_v61 = vmul.f32 %v124_v52, %v112_v59  ;;  %v128_v62 = vsub.f32 1.0, %v112_v59  ;;  %136 = vst [vmem:[#allocation7] sm:$0xff] %v112_v59 }
  0x39   :  { %v113_v0 = vsel %vm109_vm9, %v106_v56, %v111_v60 }
  0x3a   :  { %v127_v1 = vmul.f32 %v125_v57, %v113_v0  ;;  %v129_v2 = vsub.f32 1.0, %v113_v0  ;;  %137 = vst [vmem:[#allocation7 + $0x8] sm:$0xff] %v113_v0  ;;  %v132_v3 = vmul.f32 %v130_v58, %v128_v62 }
  0x3b   :  { %152 = dma.vmem_to_hbm [thread:$0]  %s145_s2, 256, %s147_s30, [#allocation4], %s301_s23, %s301_s23, %s302_s24  }
  0x3c   :  { %v133_v4 = vmul.f32 %v131_v63, %v129_v2  ;;  %v134_v5 = vsub.f32 %v126_v61, %v132_v3 }
  0x3e   :  { %v135_v6 = vsub.f32 %v127_v1, %v133_v4 }
  0x40   :  { %v138_v7 = vadd.f32 %v135_v6, %v134_v5 }
  0x42   :  { %139 = vst [vmem:[#allocation8] sm:$0xff] %v138_v7 }
  0x43   :  { %163 = dma.vmem_to_hbm [thread:$0]  %s159_s5, 128, %s161_s8, [#allocation9]  }
  0x44   :  { %296 = dma.done.wait [#allocation4], 256  }
  0x45   :  { %297 = vsyncadd [#allocation4], 4294967040 }
  0x46   :  { %298 = dma.done.wait [#allocation9], 128  }
  0x47   :  { %299 = vsyncadd [#allocation9], 4294967168 }
  0x48   :  { %172 = vsyncpa [#allocation3], 1 }
  0x49   :  { %173 = vsyncpa [#allocation6], 1 }
  0x4a   :  { %174 = vsyncpa [#allocation4], 1 }
  0x4b   :  { %175 = vsyncpa [#allocation9], 1 }

</bundles_post_ra>
